<compile_context>
chip_gen: v6e
topology: v6e:2x2x1
jax: 0.10.0
libtpu: 0.0.40
codegen_flags: <defaults>
</compile_context>

<pallas_src>
import functools

import jax
import jax.numpy as jnp
from jax.experimental import pallas as pl
from jax.experimental.pallas import tpu as pltpu

_MIB = 1024 * 1024


def _round_up(x, m):
    return ((x + m - 1) // m) * m


def _vq_decoder_kernel(c_ref, w3_ref, b3_ref, w4_ref, b4_ref, out_ref, h_ref):
    # fc3 + ReLU: computed once per batch tile (first vocab tile) and cached
    # in VMEM scratch so the j > 0 vocab tiles reuse it.
    @pl.when(pl.program_id(1) == 0)
    def _():
        h = jnp.dot(c_ref[...].astype(w3_ref.dtype), w3_ref[...],
                    preferred_element_type=jnp.float32)
        h_ref[...] = jnp.maximum(h + b3_ref[...], 0.0).astype(h_ref.dtype)

    # fc4 on the current (batch tile, vocab tile); accumulate in f32.
    o = jnp.dot(h_ref[...], w4_ref[...], preferred_element_type=jnp.float32)
    out_ref[...] = (o + b4_ref[...]).astype(out_ref.dtype)


def _vmem_bytes(bb, bn, code_dim, hidden, io_bytes, w_bytes, h_bytes):
    """Double-buffered working set for one grid step."""
    return (2 * bb * code_dim * io_bytes        # c tiles
            + 2 * bb * bn * io_bytes            # out tiles
            + 2 * code_dim * hidden * w_bytes   # W3 (grid-invariant)
            + 2 * hidden * bn * w_bytes         # W4 tiles
            + 2 * (hidden + bn) * w_bytes       # biases
            + bb * hidden * h_bytes)            # fc3 activation scratch


def _vmem_budget():
    """Generation-aware VMEM budget with headroom: 128-MiB chips (v5e/v6e)
    -> ~100 MiB, 64-MiB v7x -> ~48 MiB.  Conservative fallback if the query
    is unavailable."""
    try:
        capacity = int(pltpu.get_tpu_info().vmem_capacity_bytes)
    except Exception:
        capacity = 64 * _MIB
    budget = max(min(capacity - 16 * _MIB, 100 * _MIB), 32 * _MIB)
    return budget, capacity


@functools.partial(jax.jit, static_argnames=("block_b", "block_n"))
def vq_decoder(c, w3, b3, w4, b4, *, block_b=1024, block_n=1024):
    """c: (B, code_dim); w3: (code_dim, hidden); b3: (hidden,);
    w4: (hidden, vocab); b4: (vocab,). Returns (B, vocab) in c.dtype."""
    B, code_dim = c.shape
    hidden = w3.shape[1]
    vocab = w4.shape[1]

    io_bytes = jnp.dtype(c.dtype).itemsize
    w_bytes = jnp.dtype(w4.dtype).itemsize
    h_dtype = w4.dtype if jnp.issubdtype(w4.dtype, jnp.floating) else jnp.float32
    h_bytes = jnp.dtype(h_dtype).itemsize

    # Sublane packing multiple for the I/O dtype (8 f32, 16 bf16, 32 8-bit).
    sub = max(8, 32 // io_bytes)

    bb = min(block_b, _round_up(B, sub))
    bn = min(block_n, _round_up(vocab, 128))

    budget, capacity = _vmem_budget()
    # Shrink the vocab tile first (it does not change total W4 HBM traffic),
    # then the batch tile, until the working set fits the per-chip budget.
    while _vmem_bytes(bb, bn, code_dim, hidden, io_bytes, w_bytes, h_bytes) > budget:
        if bn > 128:
            bn = max(128, ((bn // 2) // 128) * 128)
        elif bb > sub:
            bb = max(sub, ((bb // 2) // sub) * sub)
        else:
            break

    # v7x has 2 TensorCores: make sure the "parallel" batch axis has >= 2
    # tiles whenever the batch is large enough to split.
    if _round_up(B, bb) == bb and B >= 2 * sub:
        bb = _round_up(-(-B // 2), sub)

    Bp = _round_up(B, bb)
    Vp = _round_up(vocab, bn)

    c_p = jnp.pad(c, ((0, Bp - B), (0, 0))) if Bp != B else c
    if Vp != vocab:
        w4_p = jnp.pad(w4, ((0, 0), (0, Vp - vocab)))
        b4_p = jnp.pad(b4, (0, Vp - vocab))
    else:
        w4_p, b4_p = w4, b4

    b3_2d = b3.reshape(1, hidden)
    b4_2d = b4_p.reshape(1, Vp)

    grid = (Bp // bb, Vp // bn)
    n_btiles = grid[0]

    needed = _vmem_bytes(bb, bn, code_dim, hidden, io_bytes, w_bytes, h_bytes)
    vmem_limit = int(min(max(needed + 4 * _MIB, budget), capacity - 4 * _MIB))

    # Advisory cost: W4 (and b4) are re-streamed once per batch tile.
    cost = pl.CostEstimate(
        flops=2 * Bp * (code_dim * hidden + hidden * Vp),
        transcendentals=0,
        bytes_accessed=int(c_p.size * io_bytes
                           + (w3.size + b3.size) * w_bytes
                           + n_btiles * (w4_p.size + b4_p.size) * w_bytes
                           + Bp * Vp * io_bytes),
    )

    out = pl.pallas_call(
        _vq_decoder_kernel,
        out_shape=jax.ShapeDtypeStruct((Bp, Vp), c.dtype),
        grid_spec=pltpu.PrefetchScalarGridSpec(
            num_scalar_prefetch=0,
            grid=grid,
            in_specs=[
                pl.BlockSpec((bb, code_dim), lambda i, j: (i, 0)),
                pl.BlockSpec((code_dim, hidden), lambda i, j: (0, 0)),
                pl.BlockSpec((1, hidden), lambda i, j: (0, 0)),
                pl.BlockSpec((hidden, bn), lambda i, j: (0, j)),
                pl.BlockSpec((1, bn), lambda i, j: (0, j)),
            ],
            out_specs=pl.BlockSpec((bb, bn), lambda i, j: (i, j)),
            scratch_shapes=[pltpu.VMEM((bb, hidden), h_dtype)],
        ),
        compiler_params=pltpu.CompilerParams(
            dimension_semantics=("parallel", "arbitrary"),
            vmem_limit_bytes=vmem_limit,
        ),
        cost_estimate=cost,
    )(c_p, w3, b3_2d, w4_p, b4_2d)

    return out[:B, :vocab]


def init_params(key, vocab_size, code_dim, hidden, dtype=jnp.float32):
    """PyTorch-style Linear init: U(-1/sqrt(fan_in), 1/sqrt(fan_in))."""
    k1, k2, k3, k4 = jax.random.split(key, 4)
    bound3 = 1.0 / (code_dim ** 0.5)
    bound4 = 1.0 / (hidden ** 0.5)
    w3 = jax.random.uniform(k1, (code_dim, hidden), dtype, -bound3, bound3)
    b3 = jax.random.uniform(k2, (hidden,), dtype, -bound3, bound3)
    w4 = jax.random.uniform(k3, (hidden, vocab_size), dtype, -bound4, bound4)
    b4 = jax.random.uniform(k4, (vocab_size,), dtype, -bound4, bound4)
    return w3, b3, w4, b4


if __name__ == "__main__":
    # Small shapes; the explicit-tile call exercises the batch/vocab padding
    # and 2-D grid paths (batch 12 -> padded 16 -> 2 batch tiles; vocab 200
    # -> padded 256 -> 2 vocab tiles).
    batch, code_dim, hidden, vocab_size = 12, 32, 32, 200

    key = jax.random.PRNGKey(0)
    kc, kp = jax.random.split(key)
    c = jax.random.normal(kc, (batch, code_dim), jnp.float32)
    w3, b3, w4, b4 = init_params(kp, vocab_size, code_dim, hidden)

    ref = jnp.maximum(c @ w3 + b3, 0.0) @ w4 + b4

    # 1) small explicit tiles (padding + multi-tile grid path).
    out = jax.block_until_ready(
        vq_decoder(c, w3, b3, w4, b4, block_b=8, block_n=128))
    assert out.shape == (batch, vocab_size)
    assert jnp.allclose(out, ref, atol=1e-5, rtol=1e-5)

    # 2) default (auto-sized) tiles with the generation-aware VMEM budget.
    out2 = jax.block_until_ready(vq_decoder(c, w3, b3, w4, b4))
    assert jnp.allclose(out2, ref, atol=1e-5, rtol=1e-5)

    # 3) bf16 weights: exercises the reduced-precision h-scratch / bf16 MXU
    #    path (f32 accumulation throughout).
    w3b, b3b, w4b, b4b = (x.astype(jnp.bfloat16) for x in (w3, b3, w4, b4))
    out3 = jax.block_until_ready(vq_decoder(c, w3b, b3b, w4b, b4b))
    c_b = c.astype(jnp.bfloat16)
    h_b = jnp.maximum(
        jnp.dot(c_b, w3b, preferred_element_type=jnp.float32)
        + b3b.astype(jnp.float32), 0.0).astype(jnp.bfloat16)
    ref_b = (jnp.dot(h_b, w4b, preferred_element_type=jnp.float32)
             + b4b.astype(jnp.float32))
    assert jnp.allclose(out3, ref_b, atol=5e-2, rtol=5e-2)

    print("KERNEL_OK")
</pallas_src>

<mosaic_0001>
module attributes {stable_mosaic.version = 11 : i64} {
  func.func @_vq_decoder_kernel(%arg0: i32, %arg1: i32, %arg2: memref<8x32xf32, #tpu.memory_space<vmem>>, %arg3: memref<32x32xf32, #tpu.memory_space<vmem>>, %arg4: memref<1x32xf32, #tpu.memory_space<vmem>>, %arg5: memref<32x128xf32, #tpu.memory_space<vmem>>, %arg6: memref<1x128xf32, #tpu.memory_space<vmem>>, %arg7: memref<8x128xf32, #tpu.memory_space<vmem>>, %arg8: memref<8x32xf32, #tpu.memory_space<vmem>>) attributes {dimension_semantics = [#tpu.dimension_semantics<parallel>, #tpu.dimension_semantics<arbitrary>], iteration_bounds = array<i64: 2, 2>, scalar_prefetch = 0 : i64, scratch_operands = 1 : i64, tpu.core_type = #tpu.core_type<tc>, window_params = [{transform_indices = @transform_0, window_bounds = array<i64: 8, 32>}, {pipeline_mode = #tpu.pipeline_mode<synchronous>, transform_indices = @transform_1, window_bounds = array<i64: 32, 32>}, {pipeline_mode = #tpu.pipeline_mode<synchronous>, transform_indices = @transform_2, window_bounds = array<i64: 1, 32>}, {transform_indices = @transform_3, window_bounds = array<i64: 32, 128>}, {transform_indices = @transform_4, window_bounds = array<i64: 1, 128>}, {transform_indices = @transform_5, window_bounds = array<i64: 8, 128>}]} {
    %c0_i32 = arith.constant 0 : i32
    %0 = arith.cmpi eq, %arg1, %c0_i32 : i32
    %1 = arith.extui %0 : i1 to i32
    %c0_i32_0 = arith.constant 0 : i32
    %2 = arith.cmpi ne, %1, %c0_i32_0 : i32
    scf.if %2 {
      %c0_8 = arith.constant 0 : index
      %c0_9 = arith.constant 0 : index
      %10 = vector.load %arg2[%c0_8, %c0_9] : memref<8x32xf32, #tpu.memory_space<vmem>>, vector<8x32xf32>
      %c0_10 = arith.constant 0 : index
      %c0_11 = arith.constant 0 : index
      %11 = vector.load %arg3[%c0_10, %c0_11] : memref<32x32xf32, #tpu.memory_space<vmem>>, vector<32x32xf32>
      %cst_12 = arith.constant dense<0.000000e+00> : vector<8x32xf32>
      %12 = tpu.matmul %10, %11, %cst_12 {dimension_numbers = #tpu.dot_dimension_numbers<[1], [0], [0], [1], [0, 0, 1, 1], [], []>} : vector<8x32xf32>, vector<32x32xf32>, vector<8x32xf32> -> vector<8x32xf32>
      %c0_13 = arith.constant 0 : index
      %c0_14 = arith.constant 0 : index
      %13 = vector.load %arg4[%c0_13, %c0_14] : memref<1x32xf32, #tpu.memory_space<vmem>>, vector<1x32xf32>
      %14 = vector.broadcast %13 : vector<1x32xf32> to vector<8x32xf32>
      %15 = arith.addf %12, %14 : vector<8x32xf32>
      %cst_15 = arith.constant 0.000000e+00 : f32
      %16 = vector.broadcast %cst_15 : f32 to vector<8x32xf32>
      %17 = arith.maximumf %15, %16 : vector<8x32xf32>
      %c0_16 = arith.constant 0 : index
      %c0_17 = arith.constant 0 : index
      %18 = vector.load %arg8[%c0_16, %c0_17] : memref<8x32xf32, #tpu.memory_space<vmem>>, vector<8x32xf32>
      tpu.vector_store %arg8[%c0_16, %c0_17], %17 {strides = array<i32>} : memref<8x32xf32, #tpu.memory_space<vmem>>, vector<8x32xf32>,
    } else {
    }
    %c0 = arith.constant 0 : index
    %c0_1 = arith.constant 0 : index
    %3 = vector.load %arg8[%c0, %c0_1] : memref<8x32xf32, #tpu.memory_space<vmem>>, vector<8x32xf32>
    %c0_2 = arith.constant 0 : index
    %c0_3 = arith.constant 0 : index
    %4 = vector.load %arg5[%c0_2, %c0_3] : memref<32x128xf32, #tpu.memory_space<vmem>>, vector<32x128xf32>
    %cst = arith.constant dense<0.000000e+00> : vector<8x128xf32>
    %5 = tpu.matmul %3, %4, %cst {dimension_numbers = #tpu.dot_dimension_numbers<[1], [0], [0], [1], [0, 0, 1, 1], [], []>} : vector<8x32xf32>, vector<32x128xf32>, vector<8x128xf32> -> vector<8x128xf32>
    %c0_4 = arith.constant 0 : index
    %c0_5 = arith.constant 0 : index
    %6 = vector.load %arg6[%c0_4, %c0_5] : memref<1x128xf32, #tpu.memory_space<vmem>>, vector<1x128xf32>
    %7 = vector.broadcast %6 : vector<1x128xf32> to vector<8x128xf32>
    %8 = arith.addf %5, %7 : vector<8x128xf32>
    %c0_6 = arith.constant 0 : index
    %c0_7 = arith.constant 0 : index
    %9 = vector.load %arg7[%c0_6, %c0_7] : memref<8x128xf32, #tpu.memory_space<vmem>>, vector<8x128xf32>
    tpu.vector_store %arg7[%c0_6, %c0_7], %8 {strides = array<i32>} : memref<8x128xf32, #tpu.memory_space<vmem>>, vector<8x128xf32>,
    return
  }
  func.func @transform_0(%arg0: i32, %arg1: i32) -> (i32, i32) {
    %c0_i32 = arith.constant 0 : i32
    %c0_i32_0 = arith.constant 0 : i32
    return %arg0, %c0_i32 : i32, i32
  }
  func.func @transform_1(%arg0: i32, %arg1: i32) -> (i32, i32) {
    %c0_i32 = arith.constant 0 : i32
    %c0_i32_0 = arith.constant 0 : i32
    %c0_i32_1 = arith.constant 0 : i32
    return %c0_i32, %c0_i32_0 : i32, i32
  }
  func.func @transform_2(%arg0: i32, %arg1: i32) -> (i32, i32) {
    %c0_i32 = arith.constant 0 : i32
    %c0_i32_0 = arith.constant 0 : i32
    %c0_i32_1 = arith.constant 0 : i32
    return %c0_i32, %c0_i32_0 : i32, i32
  }
  func.func @transform_3(%arg0: i32, %arg1: i32) -> (i32, i32) {
    %c0_i32 = arith.constant 0 : i32
    %c0_i32_0 = arith.constant 0 : i32
    return %c0_i32, %arg1 : i32, i32
  }
  func.func @transform_4(%arg0: i32, %arg1: i32) -> (i32, i32) {
    %c0_i32 = arith.constant 0 : i32
    %c0_i32_0 = arith.constant 0 : i32
    return %c0_i32, %arg1 : i32, i32
  }
  func.func @transform_5(%arg0: i32, %arg1: i32) -> (i32, i32) {
    %c0_i32 = arith.constant 0 : i32
    return %arg0, %arg1 : i32, i32
  }
}

</mosaic_0001>

<bundles_post_ra>
// kernel: vq_decoder.1
= control target key start
LH: loop header
LB: loop body
LE: loop exit
PB: predicated region body
PF: predicated region fallthrough
CT: control target
= control target key end

     0   :  { %s1107_s0 = inlined_call_operand.vmem [shape: f32[16,32], index: 0, kind: input, shape index: {}]   ;;  %s1108_s1 = inlined_call_operand.vmem [shape: f32[32,32], index: 1, kind: input, shape index: {}]   ;;  %s1109_s2 = inlined_call_operand.vmem [shape: f32[1,32], index: 2, kind: input, shape index: {}]   ;;  %s1110_s3 = inlined_call_operand.vmem [shape: f32[32,256], index: 3, kind: input, shape index: {}]   ;;  %s1111_s4 = inlined_call_operand.vmem [shape: f32[1,256], index: 4, kind: input, shape index: {}]   ;;  %s1112_s5 = inlined_call_operand.hbm [shape: f32[16,256], index: 5, kind: output, shape index: {}]  }
   0x1   :  { %1118 = sst [smem:[#allocation12_spill]] %s1110_s3 }
   0x2   :  { %10 = vsyncpa [#allocation5], 0 }
   0x3   :  { %12 = vsyncpa [#allocation5 + $0x1], 0  ;;  %s897_s18 = smov 0   ;;  %s899_s19 = smov 0  }
   0x4   :  { %s901_s20 = smov 0   ;;  %s903_s21 = smov 0  }
   0x5   :  { %s905_s22 = smov 0   ;;  %s907_s23 = smov 0  }
   0x6   :  { %s909_s24 = smov 0   ;;  %s911_s25 = smov 0  }
   0x7   :  { %s913_s26 = smov 0   ;;  %s915_s27 = smov 0  }
   0x8 LB: > { %1119 = sst [smem:[#allocation7_spill]] %s852_s25  ;;  %s609_s28 = sadd.s32 4294967295, %s860_s27   ;;  %s860_s27 = sphi %s915_s27, %s18_s27   ;;  %s856_s26 = sphi %s913_s26, %s1133_s26   ;;  %s852_s25 = sphi %s911_s25, %s1132_s25   ;;  %s848_s24 = sphi %s909_s24, %s1131_s24   ;;  %s844_s23 = sphi %s907_s23, %s1130_s23   ;;  %s840_s22 = sphi %s905_s22, %s1138_s22   ;;  %s836_s21 = sphi %s903_s21, %s1137_s21   ;;  %s832_s20 = sphi %s901_s20, %s1136_s20   ;;  %s828_s19 = sphi %s899_s19, %s1135_s19   ;;  %s824_s18 = sphi %s897_s18, %s1134_s18  }
   0x9   : > { %1120 = sst [smem:[#allocation8_spill]] %s856_s26  ;;  %s610_s29 = sadd.s32 4294967294, %s860_s27  }
   0xa   : > { %s27_s30 = sadd.s32 1, %s852_s25  ;;  %s30_s6 = sadd.s32 1, %s856_s26 }
   0xb   : > { %p28_p0 = scmp.ge.s32.totalorder %s27_s30, 2  ;;  %s105_s7 = sadd.s32 1, %s840_s22 }
   0xc   : > { %p112_p1 = scmp.ne.s32.totalorder %s840_s22, %s836_s21  ;;  %p113_p2 = scmp.eq.s32.totalorder %s860_s27, 0 }
   0xd   : > { %s1140_s30 = smov (%p28_p0, %s27_s30), 0  ;;  %s1142_s6 = smov (!%p28_p0, %s30_s6), %s856_s26 }
   0xe   : > { %1121 = sst [smem:[#allocation9_spill]] %s1140_s30  ;;  %s102_s8 = ssub.s32 %s852_s25, %s1140_s30 }
   0xf   : > { %p960_p3 = por %p113_p2, %p112_p1  ;;  %p32_p4 = scmp.ge.s32.totalorder %s1142_s6, 2 }
  0x10   : > { %p103_p5 = scmp.eq.s32.totalorder %s102_s8, 0  ;;  %s159_s10 = sadd.s32 1, %s832_s20 }
  0x11   : > { %p169_p6 = scmp.ne.s32.totalorder %s832_s20, %s828_s19  ;;  %s1144_s6 = smov (%p32_p4, %s1142_s6), 0 }
  0x12   : > { %1123 = sst [smem:[#allocation10_spill]] %s1144_s6  ;;  %s154_s12 = ssub.s32 %s856_s26, %s1144_s6 }
  0x13   : > { %s970_s11 = scalar_select %p103_p5, %s840_s22, %s105_s7  }
  0x14   : > { %p170_p7 = scmp.eq.s32.totalorder %s609_s28, 3  ;;  %s156_s13 = sor.u32 %s154_s12, %s102_s8 }
  0x15   : > { %1124 = sst [smem:[#allocation11_spill]] %s970_s11  ;;  %p175_p8 = scmp.ne.s32.totalorder %s828_s19, %s824_s18 }
  0x16   : > { %p157_p9 = scmp.eq.s32.totalorder %s156_s13, 0  ;;  %p976_p10 = por %p170_p7, %p169_p6 }
  0x17   : > { %p176_p11 = scmp.eq.s32.totalorder %s610_s29, 3  ;;  %p612_p13 = scmp.ge.s32.totalorder %s860_s27, 4 }
  0x18   : > { %s981_s15 = scalar_select %p157_p9, %s832_s20, %s159_s10  }
  0x19   : > { %p983_p12 = por %p176_p11, %p175_p8  ;;  %198 = sbr.rel (%p612_p13) target bundleno = 42 (0x2a), region = 24 }
  0x1e   : > { %208 = sbr.rel (!%p960_p3) target bundleno = 42 (0x2a), region = 32  ;;  %s210_s17 = sand.u32 (%p960_p3), 1, %s840_s22  }
  0x1f   : > { %s614_s28 = sshll.u32 (%p960_p3), %s852_s25, 3  ;;  %s613_s7 = sshll.u32 (%p960_p3), %s210_s17, 5 }
  0x20   : > { %s1127_s3 = sld [smem:[#allocation12_spill]] (%p960_p3)  ;;  %s212_s10 = scalar_lea.vmem (%p960_p3), [#allocation3], %s613_s7 }
  0x26   : > { %s214_s29 = scalar_lea.vmem %s1127_s3, %s614_s28 }
  0x27   : > { %v249_v0 = vld [vmem:[%s214_s29] sm:$0xff]  ;;  %v251_v1 = vld [vmem:[%s214_s29 + $0x10] sm:$0xff] }
  0x28   : > { %v253_v2 = vld [vmem:[%s214_s29 + $0x20] sm:$0xff]  ;;  %250 = vst [vmem:[%s212_s10] sm:$0xff] %v249_v0  ;;  %252 = vst [vmem:[%s212_s10 + $0x8] sm:$0xff] %v251_v1  ;;  %v255_v3 = vld [vmem:[%s214_s29 + $0x30] sm:$0xff] }
  0x29   : > { %254 = vst [vmem:[%s212_s10 + $0x10] sm:$0xff] %v253_v2  ;;  %256 = vst [vmem:[%s212_s10 + $0x18] sm:$0xff] %v255_v3 }
  0x2a PF: > { %p615_p0 = scmp.ge.s32.totalorder %s860_s27, 1  ;;  %p267_p1 = scmp.lt.s32.totalorder %s860_s27, 5 }
  0x2c   : > { %p268_p2 = pnand %p615_p0, %p267_p1 }
  0x2d   : > { %s274_s9 = sand.u32 (!%p268_p2), 1, %s836_s21   ;;  %s1115_s13 = sand.u32 (!%p268_p2), 1, %s828_s19  }
  0x2e   : > { %271 = sbr.rel (%p268_p2) target bundleno = 482 (0x1e2), region = 74  ;;  %s616_s17 = sshll.u32 (!%p268_p2), %s274_s9, 5 }
  0x2f   : > { %s1001_s28 = sshll.u32 (!%p268_p2), %s1115_s13, 3  ;;  %p308_p3 = scmp.lt.s32.totalorder (!%p268_p2), %s848_s24, 1 }
  0x30   : > { %p312_p4 = scmp.lt.s32.totalorder (!%p268_p2), %s844_s23, 1  ;;  %s1016_s9 = scalar_lea.vmem (!%p268_p2), [#allocation3], %s616_s17 }
  0x31   : > { %s307_s13 = scalar_lea.vmem (!%p268_p2), [#allocation4], %s1001_s28  ;;  %p619_p5 = scmp.ne.s32.totalorder (!%p268_p2), %s844_s23, 0 }
  0x33   : > { %s309_s7 = scalar_select %p308_p3, %s848_s24, 1 }
  0x34   : > { %s1007_s8 = scalar_select %p312_p4, %s844_s23, 1 }
  0x35   : > { %s618_s12 = sshll.u32 %s309_s7, 3  ;;  %318 = sbr.rel (%p619_p5) target bundleno = 265 (0x109), region = 82 }
  0x36   : > { %s311_s3 = scalar_lea.vmem %s1107_s0, %s618_s12  ;;  %s314_s21 = scalar_lea.vmem %s1111_s4, %s1007_s8 }
  0x3a   : > { %v323_v4 = vld [vmem:[%s1108_s1 + $0x18] sm:$0xff]  ;;  %v862_v5 = vmov 0.0   ;;  %v322_v6 = vld [vmem:[%s1108_s1 + $0x10] sm:$0xff]  ;;  %vm863_vm0 = vmmov 0   ;;  %v321_v7 = vld [vmem:[%s1108_s1 + $0x8] sm:$0xff]  ;;  %vm331_vm1 = vcmask 261120  }
  0x3b   : > { %639 = vmatprep.subr.mxu0 %v862_v5  ;;  %647 = vmatprep.mubr.msk.f32.mxu0 %vm863_vm0, %v862_v5  ;;  %v320_v8 = vld [vmem:[%s1108_s1] sm:$0xff] }
  0x3c   : > { %640 = vmatpush3.msra.mxu0 %v323_v4  ;;  %v319_v9 = vld [vmem:[%s311_s3] sm:$0xff] }
  0x3d   : > { %641 = vmatprep.subr.mxu0 %v862_v5  ;;  %v620_v10 = vld [vmem:[%s1109_s2] ss:$0 sm:$0xff] }
  0x3e   : > { %642 = vmatpush3.msra.mxu0 %v322_v6 }
  0x3f   : > { %643 = vmatprep.subr.mxu0 %v862_v5 }
  0x40   : > { %644 = vmatpush3.msra.mxu0 %v321_v7 }
  0x41   : > { %645 = vmatprep.subr.mxu0 %v862_v5 }
  0x42   : > { %646 = vmatpush3.msra.mxu0 %v320_v8 }
  0x43   : > { %648 = vmatmul.mubr.msk.f32.vlgmr.msra.gmra.mxu0 %vm331_vm1, %v319_v9 }
 0x103   : > { %v401_v11 = vpop.f32.mrf.mxu0 }
 0x104   : > { %v402_v12 = vadd.f32 %v620_v10, %v401_v11 }
 0x105   : > { %v649_v13 = vpop.f32.mrf.mxu0 }
 0x106   : > { %v405_v14 = vmax.f32 %v402_v12, 0.0 }
 0x108   : > { %406 = vst.msk [vmem:[#allocation2] sm:$0xff] %vm331_vm1, %v405_v14 }
 0x109 PF: > { %v411_v15 = vld [vmem:[%s1016_s9 + $0x18] sm:$0xff]  ;;  %v864_v16 = vmov 0.0   ;;  %v410_v17 = vld [vmem:[%s1016_s9 + $0x10] sm:$0xff]  ;;  %vm865_vm2 = vmmov 0   ;;  %v409_v18 = vld [vmem:[%s1016_s9 + $0x8] sm:$0xff]  ;;  %vm419_vm3 = vcmask 261120  }
 0x10a   : > { %650 = vmatprep.subr.mxu0 %v864_v16  ;;  %658 = vmatprep.mubr.msk.f32.mxu0 %vm865_vm2, %v864_v16  ;;  %v408_v19 = vld [vmem:[%s1016_s9] sm:$0xff]  ;;  %s625_s3 = sshll.u32 %s848_s24, 1  ;;  %v622_v21 = vld [vmem:[%s314_s21] ss:$0 sm:$0xff]  ;;  %s510_s30 = sshll.u32 %s307_s13, 4  ;;  %s511_s30 = int_to_ptr.vmem [resolvable:$true] %s510_s30 }
 0x10b   : > { %651 = vmatpush3.msra.mxu0 %v411_v15  ;;  %s506_s11 = sadd.s32 %s844_s23, %s625_s3  ;;  %s1128_s23 = sand.u32 1, %s828_s19  }
 0x10c   : > { %652 = vmatprep.subr.mxu0 %v864_v16  ;;  %s626_s7 = sshll.u32 %s506_s11, 7  ;;  %s495_s24 = scalar_lea.sflag [#allocation5], %s1128_s23 }
 0x10d   : > { %653 = vmatpush3.msra.mxu0 %v410_v17  ;;  %s1051_s17 = scalar_lea.hbm %s1112_s5, %s626_s7  ;;  %s752_s12 = scalar_lea.vmem %s511_s30, 128 }
 0x10e   : > { %654 = vmatprep.subr.mxu0 %v864_v16  ;;  %p753_p6 = scmp.ne.s32.totalorder %s511_s30, %s752_s12  ;;  %s866_s8 = smov [#allocation4]  }
 0x10f   : > { %655 = vmatpush3.msra.mxu0 %v409_v18  ;;  %v407_v20 = vld [vmem:[#allocation2] sm:$0xff]  ;;  %s756_s21 = sshll.u32 %s866_s8, 4  ;;  %s757_s21 = int_to_ptr.vmem [resolvable:$false] %s756_s21 }
 0x110   : > { %656 = vmatprep.subr.mxu0 %v864_v16  ;;  %p754_p7 = pnand %p753_p6, %p976_p10  ;;  %s758_s25 = scalar_lea.vmem %s757_s21, 256 }
 0x111   : > { %657 = vmatpush3.msra.mxu0 %v408_v19  ;;  %p759_p9 = scmp.lt.s32.totalorder %s511_s30, %s757_s21  ;;  %p760_p11 = scmp.lt.s32.totalorder %s758_s25, %s752_s12 }
 0x112   : > { %659 = vmatmul.mubr.msk.f32.vlgmr.msra.gmra.mxu0 %vm419_vm3, %v407_v20  ;;  %p755_p8 = pneg %p754_p7 }
 0x113   : > { %p761_p13 = por %p760_p11, %p759_p9 }
 0x115   : > { %p762_p0 = pnand %p761_p13, %p755_p8 }
 0x1d2   : > { %v489_v22 = vpop.f32.mrf.mxu0 }
 0x1d3   : > { %v490_v23 = vadd.f32 %v622_v21, %v489_v22 }
 0x1d4   : > { %v660_v24 = vpop.f32.mrf.mxu0 }
 0x1d5   : > { %493 = vst [vmem:[%s307_s13] sm:$0xff] %v490_v23 }
 0x1d6   : > { %765 = shalt.err (!%p762_p0)
}
 0x1d7   : > { %s766_s13 = scalar_lea.hbm %s1051_s17, 128  ;;  %s770_s3 = scalar_lea.hbm %s1112_s5, 512 }
 0x1d8   : > { %p767_p1 = scmp.ne.s32.totalorder %s1051_s17, %s766_s13  ;;  %p771_p4 = scmp.lt.s32.totalorder %s1051_s17, %s1112_s5 }
 0x1d9   : > { %p772_p5 = scmp.lt.s32.totalorder %s770_s3, %s766_s13 }
 0x1da   : > { %p768_p2 = pnand %p767_p1, %p976_p10 }
 0x1db   : > { %p773_p6 = por %p772_p5, %p771_p4 }
 0x1dc   : > { %p769_p3 = pneg %p768_p2 }
 0x1de   : > { %p774_p7 = pnand %p773_p6, %p769_p3 }
 0x1e0   : > { %777 = shalt.err (!%p774_p7)
}
 0x1e1   : > { %661 = dma.vmem_to_hbm [thread:$0]  (%p976_p10), %s511_s30, 128, %s1051_s17, %s495_s24  }
 0x1e2 PF: > { %p667_p8 = scmp.ge.s32.totalorder %s860_s27, 2  ;;  %s522_s10 = sand.u32 1, %s824_s18  }
 0x1e3   : > { %s523_s7 = scalar_lea.sflag [#allocation5], %s522_s10 }
 0x1e4   : > { %p664_p9 = pnand %p667_p8, %p983_p12 }
 0x1e6   : > { %p665_p11 = pneg %p664_p9 }
 0x1e8   : > { %819 = dma.done.wait (%p665_p11), %s523_s7, 128  }
 0x1e9   : > { %821 = vsyncadd (%p665_p11), %s523_s7, 4294967168  ;;  %s18_s27 = sadd.s32 1, %s860_s27   ;;  %s1129_s14 = sld [smem:[#allocation11_spill]] }
 0x1ea   : > { %p15_p13 = scmp.ge.s32.totalorder %s18_s27, 6   ;;  %s1130_s23 = sld [smem:[#allocation7_spill]] }
 0x1eb   : > { %s1131_s24 = sld [smem:[#allocation8_spill]]  ;;  %s1134_s18 = smov %s828_s19 }
 0x1ec   : > { %s1132_s25 = sld [smem:[#allocation9_spill]]  ;;  %s1135_s19 = smov %s832_s20 }
 0x1ed   : > { %s1133_s26 = sld [smem:[#allocation10_spill]]  ;;  %s1136_s20 = smov %s981_s15 }
 0x1ee   : > { %s1137_s21 = smov %s840_s22  ;;  %17 = sbr.rel (!%p15_p13) target bundleno = 8 (0x8), region = 128 }
 0x1ef   : > { %s1138_s22 = smov %s1129_s14 }
 0x1f3   :  { %528 = vsyncpa [#allocation5], 1 }
 0x1f4   :  { %530 = vsyncpa [#allocation5 + $0x1], 1 }

</bundles_post_ra>
